<compile_context>
chip_gen: v6e
topology: v6e:2x2x1
jax: 0.10.0
libtpu: 0.0.40
codegen_flags: <defaults>
</compile_context>

<pallas_src>
import functools
import math

import jax
import jax.numpy as jnp
import numpy as np
from jax.experimental import pallas as pl
from jax.experimental.pallas import tpu as pltpu

_LANE = 128
_SUB = 8


def _lorentz_kernel(bg_ref, freqs_ref, gamma_ref, peak_ref, a_tp_ref,
                    a_flat_ref, spectra_ref, comps_ref):
    """One (batch, T-tile): Lorentzian lineshapes, components slab, spectra."""
    x = freqs_ref[...]                                  # (1, F)
    g = gamma_ref[0]                                    # (G, 1), G = lcm(8, P)
    pk = peak_ref[0]                                    # (G, 1)
    g2 = g * g
    den = (x - pk) ** 2 + g2                            # (G, F)
    # Lorentzian is only evaluated on (G, F) rows; the reciprocal runs on the
    # EUP slot (exact mode) and its cost is negligible either way.
    l_g = g2 * pl.reciprocal(jnp.maximum(den, 1e-12), approx=False)

    # ---- components: (tT*P, F) slab, written fully contiguously -----------
    a_col = a_flat_ref[0]                               # (n, 1), n = tT*P
    n = a_col.shape[0]
    g_rows, f_dim = l_g.shape
    nrep = -(-n // g_rows)
    # g_rows is a multiple of 8, so this broadcast + merge is tile-native.
    l_rep = jnp.broadcast_to(l_g[None, :, :],
                             (nrep, g_rows, f_dim)).reshape(nrep * g_rows, f_dim)
    if nrep * g_rows != n:                              # only tiny odd T*P case
        l_rep = l_rep[:n, :]
    comps_ref[0] = a_col * l_rep                        # (n, F)

    # ---- spectra: sum over the P peaks (exact f32 on the VPU) -------------
    a_tp = a_tp_ref[0]                                  # (tT, P)
    num_peaks = a_tp.shape[1]
    acc = jnp.zeros((a_tp.shape[0], f_dim), jnp.float32)
    for p in range(num_peaks):                          # P is tiny and static
        acc = acc + a_tp[:, p:p + 1] * l_g[p:p + 1, :]
    spectra_ref[0] = acc + bg_ref[0, 0]


def _lane_pad(x):
    return -(-x // _LANE) * _LANE


def _vmem_config():
    """Generation-gated VMEM budget (tile sizing) and compiler VMEM limit."""
    cap = 64 << 20                       # conservative default (v7x per-TC)
    try:
        info = pltpu.get_tpu_info()
        c = getattr(info, "vmem_capacity_bytes", None)
        if c:
            cap = int(c)
    except Exception:
        pass
    vmem_limit = max(32 << 20, min(cap - (8 << 20), 100 << 20))
    budget = min((vmem_limit * 2) // 5, 48 << 20)
    return budget, vmem_limit


def _choose_tile_t(T, P, F, B, budget_bytes, max_tile=8192):
    """Largest T tile whose double-buffered VMEM working set fits the budget."""
    if T <= _SUB:
        return T
    f_l = _lane_pad(F)
    per_row = 4 * (P * f_l            # components block rows (P per time row)
                   + f_l              # spectra row
                   + _lane_pad(P)     # a (time-major view), P in lanes
                   + P * _LANE)       # a (flattened column view), 1 lane padded
    tile = max(1, budget_bytes // (2 * per_row))        # x2: double buffering
    tile = min(tile, max_tile, T)
    if B < 2:
        tile = min(tile, -(-T // 2))  # keep >= 2 grid steps for v7x megacore
    if tile >= T:
        return T
    return max(_SUB, (tile // _SUB) * _SUB)


@functools.partial(jax.jit, static_argnames=("min_gamma", "max_gamma",
                                             "peak_shift_limit", "tile_t"))
def lorentzian_forward(raw_a, freqs_1d, gamma_param, peak_init, peak_offset,
                       background, *, min_gamma=5.0, max_gamma=20.0,
                       peak_shift_limit=2.0, tile_t=None):
    """Mirrors BatchedSmartLorentzianTimeModel.forward()."""
    B, T, P = raw_a.shape
    F = freqs_1d.shape[0]
    G = (_SUB * P) // math.gcd(_SUB, P)            # lcm(8, P)
    delta_gamma = max_gamma - min_gamma

    # Tiny (B, P) parameter constraining + exp(raw_a) stay as XLA glue.
    # NOTE: raw_a is upcast to f32, matching the f32 PyTorch parameters.
    gamma_c = min_gamma + delta_gamma * jax.nn.sigmoid(
        gamma_param.astype(jnp.float32))                              # (B, P)
    peak_c = (peak_init.astype(jnp.float32)
              + peak_shift_limit * jnp.tanh(peak_offset.astype(jnp.float32)))
    a = jnp.exp(raw_a.astype(jnp.float32))                            # (B, T, P)
    a_flat = a.reshape(B, T * P, 1)                                   # view only

    reps = G // P
    gamma_g = jnp.tile(gamma_c, (1, reps))[:, :, None]                # (B, G, 1)
    peak_g = jnp.tile(peak_c, (1, reps))[:, :, None]                  # (B, G, 1)
    freqs_row = freqs_1d.astype(jnp.float32).reshape(1, F)
    bg = jnp.asarray(background, jnp.float32).reshape(1, 1)           # -> SMEM

    budget, vmem_limit = _vmem_config()
    if tile_t is None:
        tT = _choose_tile_t(T, P, F, B, budget)
    else:
        tT = min(int(tile_t), T)
        if tT < T:
            tT = max(_SUB, (tT // _SUB) * _SUB)
    nt = -(-T // tT)
    n_blk = tT * P

    out_shapes = (
        jax.ShapeDtypeStruct((B, T, F), jnp.float32),        # spectra
        jax.ShapeDtypeStruct((B, T * P, F), jnp.float32),    # components (flat)
    )

    spectra, comps_flat = pl.pallas_call(
        _lorentz_kernel,
        out_shape=out_shapes,
        grid=(B, nt),
        in_specs=[
            pl.BlockSpec(memory_space=pltpu.MemorySpace.SMEM),        # background
            pl.BlockSpec((1, F), lambda b, t: (0, 0)),                # freqs
            pl.BlockSpec((1, G, 1), lambda b, t: (b, 0, 0)),          # gamma rows
            pl.BlockSpec((1, G, 1), lambda b, t: (b, 0, 0)),          # peak rows
            pl.BlockSpec((1, tT, P), lambda b, t: (b, t, 0)),         # a (T, P)
            pl.BlockSpec((1, n_blk, 1), lambda b, t: (b, t, 0)),      # a (T*P, 1)
        ],
        out_specs=(
            pl.BlockSpec((1, tT, F), lambda b, t: (b, t, 0)),
            pl.BlockSpec((1, n_blk, F), lambda b, t: (b, t, 0)),
        ),
        compiler_params=pltpu.CompilerParams(
            dimension_semantics=("parallel", "parallel"),
            vmem_limit_bytes=int(vmem_limit)),
    )(bg, freqs_row, gamma_g, peak_g, a, a_flat)

    components = comps_flat.reshape(B, T, P, F)   # metadata-only reshape
    return spectra, components, a, gamma_c, jnp.asarray(background, jnp.float32)


def _reference_forward(raw_a, freqs_1d, gamma_param, peak_init, peak_offset,
                       background, min_gamma, max_gamma, peak_shift_limit):
    """Pure-JAX transcription of the PyTorch forward, for validation."""
    delta_gamma = max_gamma - min_gamma
    a = jnp.exp(raw_a)                                                  # (B,T,P)
    gamma = (min_gamma + delta_gamma * jax.nn.sigmoid(gamma_param))[:, None, :]
    peak = (peak_init + peak_shift_limit * jnp.tanh(peak_offset))[:, None, :]
    x = freqs_1d[None, :, None]                                         # (1,F,1)
    L = gamma ** 2 / jnp.maximum((x - peak) ** 2 + gamma ** 2, 1e-12)   # (B,F,P)
    Lt = jnp.transpose(L, (0, 2, 1))                                    # (B,P,F)
    components = a[..., None] * Lt[:, None, :, :]                       # (B,T,P,F)
    spectra = jnp.sum(components, axis=2) + background                  # exact f32
    return spectra, components, a, jnp.squeeze(gamma, 1), background


if __name__ == "__main__":
    min_gamma, max_gamma, peak_shift_limit = 5.0, 20.0, 2.0
    delta_gamma = max_gamma - min_gamma
    root = jax.random.PRNGKey(0)

    def make_inputs(key, B, T, F, P):
        k_a, k_off = jax.random.split(key)
        freqs_1d = jnp.linspace(0.0, 150.0, F, dtype=jnp.float32)
        param_peak = jnp.linspace(20.0, 130.0, P, dtype=jnp.float32)
        param_gamma = jnp.linspace(8.0, 15.0, P, dtype=jnp.float32)
        raw_a = jax.random.normal(k_a, (B, T, P), dtype=jnp.float32)
        gamma_param = jnp.tile((param_gamma - min_gamma)[None, :] / delta_gamma,
                               (B, 1))
        peak_init = jnp.tile(param_peak[None, :], (B, 1))
        peak_offset = 0.1 * jax.random.normal(k_off, (B, P), dtype=jnp.float32)
        background = jnp.array(0.25, dtype=jnp.float32)
        return raw_a, freqs_1d, gamma_param, peak_init, peak_offset, background

    # Case 1: module-default small shapes, one full T tile.
    # Case 2: T not divisible by the tile -> exercises partial-block clipping.
    cases = [dict(B=2, T=8, F=16, P=4, tile_t=None),
             dict(B=2, T=12, F=16, P=4, tile_t=8)]

    for i, c in enumerate(cases):
        args = make_inputs(jax.random.fold_in(root, i),
                           c["B"], c["T"], c["F"], c["P"])
        outs = lorentzian_forward(*args, min_gamma=min_gamma,
                                  max_gamma=max_gamma,
                                  peak_shift_limit=peak_shift_limit,
                                  tile_t=c["tile_t"])
        outs = jax.block_until_ready(outs)
        ref = _reference_forward(*args, min_gamma, max_gamma, peak_shift_limit)
        for got, want in zip(outs[:4], ref[:4]):
            np.testing.assert_allclose(np.asarray(got), np.asarray(want),
                                       rtol=1e-5, atol=1e-5)

    print("KERNEL_OK")
</pallas_src>

<mosaic_0001>
module attributes {stable_mosaic.version = 11 : i64} {
  func.func @_lorentz_kernel(%arg0: i32, %arg1: i32, %arg2: memref<1x1xf32, #tpu.memory_space<smem>>, %arg3: memref<1x16xf32, #tpu.memory_space<vmem>>, %arg4: memref<1x8x1xf32, #tpu.memory_space<vmem>>, %arg5: memref<1x8x1xf32, #tpu.memory_space<vmem>>, %arg6: memref<1x8x4xf32, #tpu.memory_space<vmem>>, %arg7: memref<1x32x1xf32, #tpu.memory_space<vmem>>, %arg8: memref<1x8x16xf32, #tpu.memory_space<vmem>>, %arg9: memref<1x32x16xf32, #tpu.memory_space<vmem>>) attributes {dimension_semantics = [#tpu.dimension_semantics<parallel>, #tpu.dimension_semantics<parallel>], iteration_bounds = array<i64: 2, 1>, scalar_prefetch = 0 : i64, scratch_operands = 0 : i64, tpu.core_type = #tpu.core_type<tc>, window_params = [{transform_indices = @transform_0, window_bounds = array<i64: 1, 1>}, {pipeline_mode = #tpu.pipeline_mode<synchronous>, transform_indices = @transform_1, window_bounds = array<i64: 1, 16>}, {transform_indices = @transform_2, window_bounds = array<i64: 1, 8, 1>}, {transform_indices = @transform_3, window_bounds = array<i64: 1, 8, 1>}, {transform_indices = @transform_4, window_bounds = array<i64: 1, 8, 4>}, {transform_indices = @transform_5, window_bounds = array<i64: 1, 32, 1>}, {transform_indices = @transform_6, window_bounds = array<i64: 1, 8, 16>}, {transform_indices = @transform_7, window_bounds = array<i64: 1, 32, 16>}]} {
    %c0 = arith.constant 0 : index
    %c0_0 = arith.constant 0 : index
    %0 = vector.load %arg3[%c0, %c0_0] : memref<1x16xf32, #tpu.memory_space<vmem>>, vector<1x16xf32>
    %c0_1 = arith.constant 0 : index
    %c0_2 = arith.constant 0 : index
    %c0_3 = arith.constant 0 : index
    %1 = vector.load %arg4[%c0_1, %c0_2, %c0_3] : memref<1x8x1xf32, #tpu.memory_space<vmem>>, vector<1x8x1xf32>
    %2 = vector.shape_cast %1 : vector<1x8x1xf32> to vector<8x1xf32>
    %c0_4 = arith.constant 0 : index
    %c0_5 = arith.constant 0 : index
    %c0_6 = arith.constant 0 : index
    %3 = vector.load %arg5[%c0_4, %c0_5, %c0_6] : memref<1x8x1xf32, #tpu.memory_space<vmem>>, vector<1x8x1xf32>
    %4 = vector.shape_cast %3 : vector<1x8x1xf32> to vector<8x1xf32>
    %5 = arith.mulf %2, %2 : vector<8x1xf32>
    %6 = vector.broadcast %0 : vector<1x16xf32> to vector<8x16xf32>
    %7 = vector.broadcast %4 : vector<8x1xf32> to vector<8x16xf32>
    %8 = arith.subf %6, %7 : vector<8x16xf32>
    %9 = arith.mulf %8, %8 : vector<8x16xf32>
    %10 = vector.broadcast %5 : vector<8x1xf32> to vector<8x16xf32>
    %11 = arith.addf %9, %10 : vector<8x16xf32>
    %cst = arith.constant 9.99999996E-13 : f32
    %12 = vector.broadcast %cst : f32 to vector<8x16xf32>
    %13 = arith.maximumf %11, %12 : vector<8x16xf32>
    %14 = tpu.reciprocal %13 : vector<8x16xf32> -> vector<8x16xf32>
    %15 = vector.broadcast %5 : vector<8x1xf32> to vector<8x16xf32>
    %16 = arith.mulf %15, %14 : vector<8x16xf32>
    %c0_7 = arith.constant 0 : index
    %c0_8 = arith.constant 0 : index
    %c0_9 = arith.constant 0 : index
    %17 = vector.load %arg7[%c0_7, %c0_8, %c0_9] : memref<1x32x1xf32, #tpu.memory_space<vmem>>, vector<1x32x1xf32>
    %18 = vector.shape_cast %17 : vector<1x32x1xf32> to vector<32x1xf32>
    %19 = vector.shape_cast %16 : vector<8x16xf32> to vector<1x8x16xf32>
    %20 = vector.shape_cast %19 : vector<1x8x16xf32> to vector<1x8x16xf32>
    %21 = vector.broadcast %20 : vector<1x8x16xf32> to vector<4x8x16xf32>
    %22 = vector.shape_cast %21 : vector<4x8x16xf32> to vector<32x16xf32>
    %23 = vector.broadcast %18 : vector<32x1xf32> to vector<32x16xf32>
    %24 = arith.mulf %23, %22 : vector<32x16xf32>
    %c0_10 = arith.constant 0 : index
    %c0_11 = arith.constant 0 : index
    %c0_12 = arith.constant 0 : index
    %25 = vector.load %arg9[%c0_10, %c0_11, %c0_12] : memref<1x32x16xf32, #tpu.memory_space<vmem>>, vector<1x32x16xf32>
    %26 = vector.shape_cast %25 : vector<1x32x16xf32> to vector<32x16xf32>
    %27 = vector.shape_cast %24 : vector<32x16xf32> to vector<1x32x16xf32>
    tpu.vector_store %arg9[%c0_10, %c0_11, %c0_12], %27 {strides = array<i32>} : memref<1x32x16xf32, #tpu.memory_space<vmem>>, vector<1x32x16xf32>,
    %c0_13 = arith.constant 0 : index
    %c0_14 = arith.constant 0 : index
    %c0_15 = arith.constant 0 : index
    %28 = vector.load %arg6[%c0_13, %c0_14, %c0_15] : memref<1x8x4xf32, #tpu.memory_space<vmem>>, vector<1x8x4xf32>
    %29 = vector.shape_cast %28 : vector<1x8x4xf32> to vector<8x4xf32>
    %cst_16 = arith.constant 0.000000e+00 : f32
    %30 = vector.broadcast %cst_16 : f32 to vector<8x16xf32>
    %31 = vector.extract_strided_slice %29 {offsets = [0, 0], sizes = [8, 1], strides = [1, 1]} : vector<8x4xf32> to vector<8x1xf32>
    %32 = vector.extract_strided_slice %16 {offsets = [0, 0], sizes = [1, 16], strides = [1, 1]} : vector<8x16xf32> to vector<1x16xf32>
    %33 = vector.broadcast %31 : vector<8x1xf32> to vector<8x16xf32>
    %34 = vector.broadcast %32 : vector<1x16xf32> to vector<8x16xf32>
    %35 = arith.mulf %33, %34 : vector<8x16xf32>
    %36 = arith.addf %30, %35 : vector<8x16xf32>
    %37 = vector.extract_strided_slice %29 {offsets = [0, 1], sizes = [8, 1], strides = [1, 1]} : vector<8x4xf32> to vector<8x1xf32>
    %38 = vector.extract_strided_slice %16 {offsets = [1, 0], sizes = [1, 16], strides = [1, 1]} : vector<8x16xf32> to vector<1x16xf32>
    %39 = vector.broadcast %37 : vector<8x1xf32> to vector<8x16xf32>
    %40 = vector.broadcast %38 : vector<1x16xf32> to vector<8x16xf32>
    %41 = arith.mulf %39, %40 : vector<8x16xf32>
    %42 = arith.addf %36, %41 : vector<8x16xf32>
    %43 = vector.extract_strided_slice %29 {offsets = [0, 2], sizes = [8, 1], strides = [1, 1]} : vector<8x4xf32> to vector<8x1xf32>
    %44 = vector.extract_strided_slice %16 {offsets = [2, 0], sizes = [1, 16], strides = [1, 1]} : vector<8x16xf32> to vector<1x16xf32>
    %45 = vector.broadcast %43 : vector<8x1xf32> to vector<8x16xf32>
    %46 = vector.broadcast %44 : vector<1x16xf32> to vector<8x16xf32>
    %47 = arith.mulf %45, %46 : vector<8x16xf32>
    %48 = arith.addf %42, %47 : vector<8x16xf32>
    %49 = vector.extract_strided_slice %29 {offsets = [0, 3], sizes = [8, 1], strides = [1, 1]} : vector<8x4xf32> to vector<8x1xf32>
    %50 = vector.extract_strided_slice %16 {offsets = [3, 0], sizes = [1, 16], strides = [1, 1]} : vector<8x16xf32> to vector<1x16xf32>
    %51 = vector.broadcast %49 : vector<8x1xf32> to vector<8x16xf32>
    %52 = vector.broadcast %50 : vector<1x16xf32> to vector<8x16xf32>
    %53 = arith.mulf %51, %52 : vector<8x16xf32>
    %54 = arith.addf %48, %53 : vector<8x16xf32>
    %c0_17 = arith.constant 0 : index
    %c0_18 = arith.constant 0 : index
    %55 = memref.load %arg2[%c0_17, %c0_18] : memref<1x1xf32, #tpu.memory_space<smem>>
    %56 = vector.broadcast %55 : f32 to vector<8x16xf32>
    %57 = arith.addf %54, %56 : vector<8x16xf32>
    %c0_19 = arith.constant 0 : index
    %c0_20 = arith.constant 0 : index
    %c0_21 = arith.constant 0 : index
    %58 = vector.load %arg8[%c0_19, %c0_20, %c0_21] : memref<1x8x16xf32, #tpu.memory_space<vmem>>, vector<1x8x16xf32>
    %59 = vector.shape_cast %58 : vector<1x8x16xf32> to vector<8x16xf32>
    %60 = vector.shape_cast %57 : vector<8x16xf32> to vector<1x8x16xf32>
    tpu.vector_store %arg8[%c0_19, %c0_20, %c0_21], %60 {strides = array<i32>} : memref<1x8x16xf32, #tpu.memory_space<vmem>>, vector<1x8x16xf32>,
    return
  }
  func.func @transform_0(%arg0: i32, %arg1: i32) -> (i32, i32) {
    %c0_i32 = arith.constant 0 : i32
    %c0_i32_0 = arith.constant 0 : i32
    %c0_i32_1 = arith.constant 0 : i32
    return %c0_i32, %c0_i32_0 : i32, i32
  }
  func.func @transform_1(%arg0: i32, %arg1: i32) -> (i32, i32) {
    %c0_i32 = arith.constant 0 : i32
    %c0_i32_0 = arith.constant 0 : i32
    %c0_i32_1 = arith.constant 0 : i32
    return %c0_i32, %c0_i32_0 : i32, i32
  }
  func.func @transform_2(%arg0: i32, %arg1: i32) -> (i32, i32, i32) {
    %c0_i32 = arith.constant 0 : i32
    %c0_i32_0 = arith.constant 0 : i32
    %c0_i32_1 = arith.constant 0 : i32
    return %arg0, %c0_i32, %c0_i32_0 : i32, i32, i32
  }
  func.func @transform_3(%arg0: i32, %arg1: i32) -> (i32, i32, i32) {
    %c0_i32 = arith.constant 0 : i32
    %c0_i32_0 = arith.constant 0 : i32
    %c0_i32_1 = arith.constant 0 : i32
    return %arg0, %c0_i32, %c0_i32_0 : i32, i32, i32
  }
  func.func @transform_4(%arg0: i32, %arg1: i32) -> (i32, i32, i32) {
    %c0_i32 = arith.constant 0 : i32
    %c0_i32_0 = arith.constant 0 : i32
    return %arg0, %arg1, %c0_i32 : i32, i32, i32
  }
  func.func @transform_5(%arg0: i32, %arg1: i32) -> (i32, i32, i32) {
    %c0_i32 = arith.constant 0 : i32
    %c0_i32_0 = arith.constant 0 : i32
    return %arg0, %arg1, %c0_i32 : i32, i32, i32
  }
  func.func @transform_6(%arg0: i32, %arg1: i32) -> (i32, i32, i32) {
    %c0_i32 = arith.constant 0 : i32
    %c0_i32_0 = arith.constant 0 : i32
    return %arg0, %arg1, %c0_i32 : i32, i32, i32
  }
  func.func @transform_7(%arg0: i32, %arg1: i32) -> (i32, i32, i32) {
    %c0_i32 = arith.constant 0 : i32
    %c0_i32_0 = arith.constant 0 : i32
    return %arg0, %arg1, %c0_i32 : i32, i32, i32
  }
}

</mosaic_0001>

<bundles_post_ra>
// kernel: lorentzian_forward.1
= control target key start
LH: loop header
LB: loop body
LE: loop exit
PB: predicated region body
PF: predicated region fallthrough
CT: control target
= control target key end

     0   :  { %s1092_s0 = inlined_call_operand.<no memory space> [shape: f32[1,1], index: 0, kind: input, shape index: {}]   ;;  %s1093_s1 = inlined_call_operand.vmem [shape: f32[1,16], index: 1, kind: input, shape index: {}]   ;;  %s1094_s2 = inlined_call_operand.vmem [shape: f32[2,8,1], index: 2, kind: input, shape index: {}]   ;;  %s1095_s3 = inlined_call_operand.vmem [shape: f32[2,8,1], index: 3, kind: input, shape index: {}]   ;;  %s1096_s4 = inlined_call_operand.vmem [shape: f32[2,8,4], index: 4, kind: input, shape index: {}]   ;;  %s1097_s5 = inlined_call_operand.vmem [shape: f32[2,32,1], index: 5, kind: input, shape index: {}]   ;;  %s1098_s6 = inlined_call_operand.hbm [shape: f32[2,8,16], index: 6, kind: output, shape index: {0}]   ;;  %s1099_s7 = inlined_call_operand.hbm [shape: f32[2,32,16], index: 7, kind: output, shape index: {1}]  }
   0x1   :  { %1100 = sst [smem:[#allocation9_spill]] %s1093_s1 }
   0x2   :  { %1101 = sst [smem:[#allocation10_spill]] %s1094_s2 }
   0x3   :  { %13 = sst [smem:[#allocation2]] %s1092_s0 }
   0x4   :  { %14 = vsyncpa [#allocation4], 0 }
   0x5   :  { %16 = vsyncpa [#allocation4 + $0x1], 0 }
   0x6   :  { %17 = vsyncpa [#allocation6], 0 }
   0x7   :  { %19 = vsyncpa [#allocation6 + $0x1], 0  ;;  %s932_s26 = smov 0   ;;  %s934_s27 = smov 0  }
   0x8   :  { %s936_s28 = smov 0   ;;  %s938_s29 = smov 0  }
   0x9   :  { %s940_s30 = smov 0   ;;  %s942_s8 = smov 0  }
   0xa LB: > { %s675_s0 = sadd.s32 4294967295, %s879_s8   ;;  %s676_s9 = sadd.s32 4294967294, %s879_s8   ;;  %s879_s8 = sphi %s942_s8, %s25_s8   ;;  %s875_s30 = sphi %s940_s30, %s1111_s30   ;;  %s871_s29 = sphi %s938_s29, %s1110_s29   ;;  %s867_s28 = sphi %s936_s28, %s1109_s28   ;;  %s863_s27 = sphi %s934_s27, %s1108_s27   ;;  %s859_s26 = sphi %s932_s26, %s1107_s26  }
   0xb   : > { %s37_s10 = sadd.s32 1, %s875_s30  ;;  %s196_s11 = sadd.s32 1, %s867_s28 }
   0xc   : > { %p39_p0 = scmp.ge.s32.totalorder %s37_s10, 2  ;;  %p206_p1 = scmp.ne.s32.totalorder %s867_s28, %s863_s27 }
   0xd   : > { %p207_p2 = scmp.eq.s32.totalorder %s675_s0, 1  ;;  %p212_p3 = scmp.ne.s32.totalorder %s863_s27, %s859_s26 }
   0xe   : > { %s1113_s10 = smov (%p39_p0, %s37_s10), 0  ;;  %p213_p5 = scmp.eq.s32.totalorder %s676_s9, 1 }
   0xf   : > { %p972_p4 = por %p207_p2, %p206_p1  ;;  %s191_s13 = ssub.s32 %s875_s30, %s1113_s10 }
  0x10   : > { %p679_p6 = scmp.ge.s32.totalorder %s879_s8, 1  ;;  %p194_p7 = scmp.eq.s32.totalorder %s191_s13, 0 }
  0x11   : > { %p979_p8 = por %p213_p5, %p212_p3  ;;  %p302_p9 = scmp.lt.s32.totalorder %s879_s8, 3 }
  0x12   : > { %s985_s15 = scalar_select %p194_p7, %s867_s28, %s196_s11  }
  0x13   : > { %p303_p10 = pnand %p679_p6, %p302_p9 }
  0x14   : > { %p358_p11 = scmp.lt.s32.totalorder (!%p303_p10), %s871_s29, 1  ;;  %s1104_s2 = sld [smem:[#allocation10_spill]] (!%p303_p10) }
  0x15   : > { %306 = sbr.rel (%p303_p10) target bundleno = 221 (0xdd), region = 44  ;;  %s1105_s1 = sld [smem:[#allocation9_spill]] (!%p303_p10) }
  0x16   : > { %s1007_s19 = sand.u32 (!%p303_p10), 1, %s863_s27   ;;  %s1013_s24 = sld [smem:[#allocation2]] (!%p303_p10) }
  0x17   : > { %s495_s13 = scalar_lea.sflag (!%p303_p10), [#allocation6], %s1007_s19 }
  0x1a   : > { %v881_v0 = vmov 0   ;;  %s359_s16 = scalar_select %p358_p11, %s871_s29, 1  ;;  %v882_v5 = vmov 1   ;;  %v883_v6 = vmov 2   ;;  %v884_v7 = vmov 3  }
  0x1b   : > { %763 = vset.pattern.permute.xlu0 %v881_v0  ;;  %764 = vset.pattern.permute.xlu1 %v881_v0  ;;  %v687_v12 = vld [vmem:[%s1105_s1] ss:$0 sm:$0xff]  ;;  %v449_v22 = vlaneseq  ;;  %vm438_vm0 = vcmask 130048  }
  0x1c   : > { %s682_s17 = sshll.u32 %s359_s16, 3  ;;  %s695_s9 = sshll.u32 %s359_s16, 5 }
  0x1d   : > { %s365_s20 = scalar_lea.vmem %s1095_s3, %s682_s17  ;;  %s372_s23 = scalar_lea.vmem %s1096_s4, %s682_s17  ;;  %v450_v24 = vshrl.u32 %v449_v22, 7 }
  0x1e   : > { %v386_v1 = vld [vmem:[%s365_s20] sm:$0xff]  ;;  %s361_s0 = scalar_lea.vmem %s1104_s2, %s682_s17  ;;  %s381_s18 = scalar_lea.vmem %s1097_s5, %s695_s9 }
  0x1f   : > { %v443_v2 = vld [vmem:[%s372_s23] sm:$0xff]  ;;  %396 = vperm.xlu0 %763, %v386_v1   ;;  %v411_v8 = vld [vmem:[%s381_s18 + $0x8] sm:$0xff]  ;;  %v412_v10 = vld [vmem:[%s381_s18 + $0x10] sm:$0xff]  ;;  %s681_s20 = sshll.u32 %s1007_s19, 5  ;;  %v451_v27 = vsub.s32 0, %v450_v24  ;;  %v461_v28 = vsub.s32 1, %v450_v24 }
  0x20   : > { %446 = vperm.xlu1 %764, %v443_v2   ;;  %v385_v3 = vld [vmem:[%s361_s0] sm:$0xff]  ;;  %v413_v11 = vld [vmem:[%s381_s18 + $0x18] sm:$0xff]  ;;  %s357_s21 = scalar_lea.vmem [#allocation5], %s681_s20  ;;  %v471_v30 = vsub.s32 2, %v450_v24  ;;  %s696_s23 = sshll.u32 %s871_s29, 9  ;;  %v481_v32 = vsub.s32 3, %v450_v24 }
  0x21   : > { %v387_v4 = vmul.f32 %v385_v3, %v385_v3  ;;  %v410_v9 = vld [vmem:[%s381_s18] sm:$0xff]  ;;  %s524_s22 = sshll.u32 %s357_s21, 4  ;;  %s1019_s11 = scalar_lea.hbm %s1099_s7, %s696_s23  ;;  %s1011_s22 = int_to_ptr.vmem [resolvable:$true] %s524_s22 }
  0x22   : > { %s773_s18 = scalar_lea.vmem %s1011_s22, 512  ;;  %s885_s16 = smov [#allocation5]  }
  0x23   : > { %403 = vperm.xlu0 %763, %v387_v4   ;;  %p774_p12 = scmp.ne.s32.totalorder %s1011_s22, %s773_s18  ;;  %s777_s17 = sshll.u32 %s885_s16, 4  ;;  %s778_s17 = int_to_ptr.vmem [resolvable:$false] %s777_s17 }
  0x24   : > { %765 = vset.pattern.permute.xlu1 %v882_v5  ;;  %s779_s20 = scalar_lea.vmem %s778_s17, 1024  ;;  %p780_p1 = scmp.lt.s32.totalorder %s1011_s22, %s778_s17 }
  0x25   : > { %456 = vperm.xlu1 %765, %v443_v2   ;;  %p775_p13 = pnand %p774_p12, %p972_p4  ;;  %p781_p2 = scmp.lt.s32.totalorder %s779_s20, %s773_s18 }
  0x27   : > { %766 = vset.pattern.permute.xlu0 %v883_v6  ;;  %p776_p0 = pneg %p775_p13  ;;  %p782_p3 = por %p781_p2, %p780_p1 }
  0x28   : > { %466 = vperm.xlu0 %766, %v443_v2  }
  0x29   : > { %767 = vset.pattern.permute.xlu1 %v884_v7  ;;  %p783_p5 = pnand %p782_p3, %p776_p0 }
  0x2a   : > { %476 = vperm.xlu1 %767, %v443_v2  }
  0x2c   : > { %769 = vset.pattern.permute.xlu0 %v881_v0 }
  0x2d   : > { %421 = vperm.xlu0 %769, %v411_v8  }
  0x2e   : > { %768 = vset.pattern.permute.xlu1 %v881_v0 }
  0x2f   : > { %416 = vperm.xlu1 %768, %v410_v9  }
  0x31   : > { %770 = vset.pattern.permute.xlu0 %v884_v7 }
  0x33   : > { %426 = vperm.xlu1 %768, %v412_v10  }
  0x37   : > { %431 = vperm.xlu1 %768, %v413_v11  }
  0x9a   : > { %v397_v13 = vpop.permute.xlu0 %396 }
  0x9b   : > { %v447_v14 = vpop.permute.xlu1 %446  ;;  %v399_v15 = vsub.f32 %v687_v12, %v397_v13 }
  0x9d   : > { %v400_v16 = vmul.f32 %v399_v15, %v399_v15 }
  0x9e   : > { %v404_v17 = vpop.permute.xlu0 %403 }
  0x9f   : > { %v406_v18 = vadd.f32 %v404_v17, %v400_v16 }
  0xa0   : > { %v457_v19 = vpop.permute.xlu1 %456 }
  0xa1   : > { %v407_v20 = vmax.f32 %v406_v18, 1e-12 }
  0xa3   : > { %771 = vrcp.f32 %v407_v20  ;;  %v467_v25 = vpop.permute.xlu0 %466 }
  0xa5   : > { %v1004_v21 = vpop.permute.xlu1 %476 }
  0xa8   : > { %v422_v34 = vpop.permute.xlu0 %421 }
  0xaa   : > { %v417_v23 = vpop.permute.xlu1 %416 }
  0xae   : > { %v427_v26 = vpop.permute.xlu1 %426 }
  0xb0   : > { %v772_v29 = vpop.eup %771 }
  0xb1   : > { %v409_v31 = vmul.f32 %v772_v29, %v404_v17 }
  0xb2   : > { %v432_v33 = vpop.permute.xlu1 %431 }
  0xb3   : > { %v452_v35 = vrot.slane %v409_v31, %v451_v27  ;;  %v462_v36 = vrot.slane %v409_v31, %v461_v28  ;;  %v434_v37 = vmul.f32 %v417_v23, %v409_v31  ;;  %v436_v38 = vmul.f32 %v427_v26, %v409_v31 }
  0xb4   : > { %v472_v39 = vrot.slane %v409_v31, %v471_v30  ;;  %v437_v40 = vmul.f32 %v432_v33, %v409_v31  ;;  %v435_v41 = vmul.f32 %v422_v34, %v409_v31  ;;  %v482_v44 = vrot.slane %v409_v31, %v481_v32 }
  0xb5   : > { %v453_v42 = vmul.f32 %v452_v35, %v447_v14  ;;  %v463_v43 = vmul.f32 %v462_v36, %v457_v19  ;;  %439 = vst.msk [vmem:[%s357_s21] sm:$0xff] %vm438_vm0, %v434_v37  ;;  %441 = vst.msk [vmem:[%s357_s21 + $0x10] sm:$0xff] %vm438_vm0, %v436_v38 }
  0xb6   : > { %442 = vst.msk [vmem:[%s357_s21 + $0x18] sm:$0xff] %vm438_vm0, %v437_v40  ;;  %440 = vst.msk [vmem:[%s357_s21 + $0x8] sm:$0xff] %vm438_vm0, %v435_v41  ;;  %v473_v46 = vmul.f32 %v472_v39, %v467_v25 }
  0xb7   : > { %v464_v45 = vadd.f32 %v463_v43, %v453_v42 }
  0xb8   : > { %786 = shalt.err (!%p783_p5)
}
  0xb9   : > { %s787_s21 = scalar_lea.hbm %s1019_s11, 512  ;;  %s791_s9 = scalar_lea.hbm %s1099_s7, 1024 }
  0xba   : > { %p788_p6 = scmp.ne.s32.totalorder %s1019_s11, %s787_s21  ;;  %p792_p10 = scmp.lt.s32.totalorder %s1019_s11, %s1099_s7 }
  0xbb   : > { %p793_p11 = scmp.lt.s32.totalorder %s791_s9, %s787_s21 }
  0xbc   : > { %p789_p7 = pnand %p788_p6, %p972_p4 }
  0xbd   : > { %p794_p12 = por %p793_p11, %p792_p10 }
  0xbe   : > { %p790_p9 = pneg %p789_p7 }
  0xc0   : > { %p795_p13 = pnand %p794_p12, %p790_p9 }
  0xc2   : > { %798 = shalt.err (!%p795_p13)
}
  0xc3   : > { %s886_s18 = smov 128   ;;  %s887_s17 = smov 8   ;;  %v483_v47 = vmul.f32 %v482_v44, %v1004_v21  ;;  %v474_v48 = vadd.f32 %v473_v46, %v464_v45  ;;  %v486_v49 = vstv %s1013_s24 }
  0xc4   : > { %698 = dma.vmem_to_hbm [thread:$0]  (%p972_p4), %s1011_s22, 512, %s1019_s11, %s495_s13, %s886_s18, %s886_s18, %s887_s17  }
  0xc5   : > { %s690_s25 = sshll.u32 %s871_s29, 7  ;;  %s1106_s20 = sshll.u32 %s1007_s19, 3  ;;  %v484_v50 = vadd.f32 %v483_v47, %v474_v48 }
  0xc6   : > { %s350_s21 = scalar_lea.vmem [#allocation3], %s1106_s20  ;;  %s507_s16 = scalar_lea.hbm %s1098_s6, %s690_s25 }
  0xc7   : > { %s509_s23 = sshll.u32 %s350_s21, 4  ;;  %v487_v51 = vadd.f32 %v486_v49, %v484_v50  ;;  %s490_s1 = scalar_lea.sflag [#allocation4], %s1007_s19  ;;  %s510_s23 = int_to_ptr.vmem [resolvable:$true] %s509_s23 }
  0xc8   : > { %s799_s2 = scalar_lea.vmem %s510_s23, 128  ;;  %s888_s22 = smov [#allocation3]  }
  0xc9   : > { %488 = vst.msk [vmem:[%s350_s21] sm:$0xff] %vm438_vm0, %v487_v51  ;;  %p800_p0 = scmp.ne.s32.totalorder %s510_s23, %s799_s2  ;;  %s803_s29 = sshll.u32 %s888_s22, 4  ;;  %s804_s29 = int_to_ptr.vmem [resolvable:$false] %s803_s29 }
  0xca   : > { %s805_s24 = scalar_lea.vmem %s804_s29, 256  ;;  %p806_p3 = scmp.lt.s32.totalorder %s510_s23, %s804_s29 }
  0xcb   : > { %p801_p1 = pnand %p800_p0, %p972_p4  ;;  %p807_p5 = scmp.lt.s32.totalorder %s805_s24, %s799_s2 }
  0xcd   : > { %p802_p2 = pneg %p801_p1  ;;  %p808_p6 = por %p807_p5, %p806_p3 }
  0xcf   : > { %p809_p7 = pnand %p808_p6, %p802_p2 }
  0xd1   : > { %812 = shalt.err (!%p809_p7)
}
  0xd2   : > { %s813_s11 = scalar_lea.hbm %s507_s16, 128  ;;  %s817_s18 = scalar_lea.hbm %s1098_s6, 256 }
  0xd3   : > { %p814_p9 = scmp.ne.s32.totalorder %s507_s16, %s813_s11  ;;  %p818_p12 = scmp.lt.s32.totalorder %s507_s16, %s1098_s6 }
  0xd4   : > { %p819_p13 = scmp.lt.s32.totalorder %s817_s18, %s813_s11 }
  0xd5   : > { %p815_p10 = pnand %p814_p9, %p972_p4 }
  0xd6   : > { %p820_p0 = por %p819_p13, %p818_p12 }
  0xd7   : > { %p816_p11 = pneg %p815_p10 }
  0xd9   : > { %p821_p1 = pnand %p820_p0, %p816_p11 }
  0xdb   : > { %824 = shalt.err (!%p821_p1)
}
  0xdc   : > { %697 = dma.vmem_to_hbm [thread:$0]  (%p972_p4), %s510_s23, 128, %s507_s16, %s490_s1  }
  0xdd PF: > { %p708_p2 = scmp.ge.s32.totalorder %s879_s8, 2  ;;  %s539_s2 = sand.u32 1, %s859_s26  }
  0xde   : > { %s540_s20 = scalar_lea.sflag [#allocation4], %s539_s2 }
  0xdf   : > { %p702_p3 = pnand %p708_p2, %p979_p8 }
  0xe1   : > { %p703_p5 = pneg %p702_p3 }
  0xe3   : > { %850 = dma.done.wait (%p703_p5), %s540_s20, 128  }
  0xe4   : > { %852 = vsyncadd (%p703_p5), %s540_s20, 4294967168  ;;  %s549_s21 = scalar_lea.sflag [#allocation6], %s539_s2 }
  0xe5   : > { %854 = dma.done.wait (%p703_p5), %s549_s21, 512  }
  0xe6   : > { %856 = vsyncadd (%p703_p5), %s549_s21, 4294966784  ;;  %s25_s8 = sadd.s32 1, %s879_s8   ;;  %s1107_s26 = smov %s863_s27 }
  0xe7   : > { %p22_p6 = scmp.ge.s32.totalorder %s25_s8, 4   ;;  %s1108_s27 = smov %s867_s28 }
  0xe8   : > { %s1109_s28 = smov %s985_s15  ;;  %s1110_s29 = smov %s875_s30 }
  0xe9   : > { %s1111_s30 = smov %s1113_s10  ;;  %24 = sbr.rel (!%p22_p6) target bundleno = 10 (0xa), region = 105 }
  0xee   :  { %554 = vsyncpa [#allocation4], 1 }
  0xef   :  { %556 = vsyncpa [#allocation4 + $0x1], 1 }
  0xf0   :  { %557 = vsyncpa [#allocation6], 1 }
  0xf1   :  { %559 = vsyncpa [#allocation6 + $0x1], 1 }

</bundles_post_ra>
